<compile_context>
chip_gen: v5e
topology: v5e:2x2
jax: 0.10.0
libtpu: 0.0.40
codegen_flags: <defaults>
</compile_context>

<pallas_src>
import functools

import jax
import jax.numpy as jnp
from jax.experimental import pallas as pl
from jax.experimental.pallas import tpu as pltpu


# -----------------------------------------------------------------------------
# Kernels
# -----------------------------------------------------------------------------
def _mlp_fused_kernel(x_ref, w_ref, b_ref, o_ref):
    """out = tanh(x @ w + b), whole K in one dot (paths 1 and 2)."""
    z = jnp.dot(x_ref[...], w_ref[...], preferred_element_type=jnp.float32)
    z = z + b_ref[...].astype(jnp.float32)
    o_ref[...] = jnp.tanh(z).astype(o_ref.dtype)


def _mlp_tiled_kernel(x_ref, w_ref, b_ref, o_ref, acc_ref):
    """(tm, tn) output tile; K reduction along grid axis 2 (path 3).

    Bias is folded into the accumulator init so the finalize step is just
    tanh + cast (no extra broadcast/add in the epilogue).
    """
    k = pl.program_id(2)

    @pl.when(k == 0)
    def _():
        acc_ref[...] = jnp.broadcast_to(
            b_ref[...].astype(jnp.float32), acc_ref.shape
        )

    acc_ref[...] += jnp.dot(
        x_ref[...], w_ref[...], preferred_element_type=jnp.float32
    )

    @pl.when(k == pl.num_programs(2) - 1)
    def _():
        o_ref[...] = jnp.tanh(acc_ref[...]).astype(o_ref.dtype)


# -----------------------------------------------------------------------------
# Wrapper
# -----------------------------------------------------------------------------
def _round_up(x, m):
    return ((x + m - 1) // m) * m


@functools.partial(
    jax.jit,
    static_argnames=(
        "tm", "tn", "tk", "compute_dtype",
        "single_block_max_bytes", "weight_resident_max_bytes",
    ),
)
def mlp_layer(
    features,
    weight_t,
    bias,
    *,
    tm=256,
    tn=256,
    tk=512,
    compute_dtype=None,
    single_block_max_bytes=4 << 20,
    weight_resident_max_bytes=8 << 20,
):
    """tanh(features @ weight_t + bias).

    features: [M, K], weight_t: [K, N] (PyTorch weight [N, K] pre-transposed),
    bias: [N]. Output dtype matches the input features dtype.
    """
    out_dtype = features.dtype
    if compute_dtype is not None:
        # bf16 operands keep MXU throughput high on v6e/v7x and halve DMA
        # bytes; accumulation and the tanh epilogue stay in f32.
        features = features.astype(compute_dtype)
        weight_t = weight_t.astype(compute_dtype)

    M, K = features.shape
    K2, N = weight_t.shape
    assert K == K2, (K, K2)
    assert bias.shape == (N,), bias.shape
    bias2d = bias.reshape(1, N)

    in_isz = jnp.dtype(features.dtype).itemsize
    out_isz = jnp.dtype(out_dtype).itemsize

    # Clamp tile sizes to the (8,128)-rounded problem dims so small problems
    # don't pay for padded tiles far larger than the data.
    tm_eff = min(tm, _round_up(M, 8))
    tn_eff = min(tn, _round_up(N, 128))
    tk_eff = min(tk, _round_up(K, 128))

    # ---- Path 1: whole problem comfortably fits VMEM -> single invocation.
    # Removes all per-grid-step overhead for the tiny projection-head case.
    total_bytes = (M * K + K * N + N) * in_isz + M * N * out_isz
    if total_bytes <= single_block_max_bytes:
        return pl.pallas_call(
            _mlp_fused_kernel,
            out_shape=jax.ShapeDtypeStruct((M, N), out_dtype),
            in_specs=[
                pl.BlockSpec(memory_space=pltpu.MemorySpace.VMEM),
                pl.BlockSpec(memory_space=pltpu.MemorySpace.VMEM),
                pl.BlockSpec(memory_space=pltpu.MemorySpace.VMEM),
            ],
            out_specs=pl.BlockSpec(memory_space=pltpu.MemorySpace.VMEM),
        )(features, weight_t, bias2d)

    # ---- Path 2: weight (+ bias) fits VMEM -> keep it resident and tile only
    # over M. Each grid step is a full-K dot on a (tm_eff, K) slab; the weight
    # is DMA'd once instead of being re-streamed per M tile.
    weight_bytes = (K * N + N) * in_isz
    p2_budget = 2 * (tm_eff * K * in_isz + tm_eff * N * out_isz) + 2 * weight_bytes
    if weight_bytes <= weight_resident_max_bytes and p2_budget <= (24 << 20):
        Mp = _round_up(M, tm_eff)
        x_p = features if Mp == M else jnp.pad(features, ((0, Mp - M), (0, 0)))
        vmem_limit = int(min(max(2 * p2_budget, 16 << 20), 32 << 20))
        out = pl.pallas_call(
            _mlp_fused_kernel,
            out_shape=jax.ShapeDtypeStruct((Mp, N), out_dtype),
            grid_spec=pltpu.PrefetchScalarGridSpec(
                num_scalar_prefetch=0,
                grid=(Mp // tm_eff,),
                in_specs=[
                    pl.BlockSpec((tm_eff, K), lambda i: (i, 0)),  # features slab
                    pl.BlockSpec((K, N), lambda i: (0, 0)),       # resident weight
                    pl.BlockSpec((1, N), lambda i: (0, 0)),       # resident bias
                ],
                out_specs=pl.BlockSpec((tm_eff, N), lambda i: (i, 0)),
            ),
            compiler_params=pltpu.CompilerParams(
                dimension_semantics=("parallel",),
                vmem_limit_bytes=vmem_limit,
            ),
        )(x_p, weight_t, bias2d)
        return out[:M]

    # ---- Path 3: fully tiled (M, N, K) matmul with f32 accumulator scratch.
    # Reduction axis (K) is the last grid axis; output tile is resident across
    # it and initialized with the bias at k == 0.
    Mp = _round_up(M, tm_eff)
    Np = _round_up(N, tn_eff)
    Kp = _round_up(K, tk_eff)
    x_p = (
        features
        if (Mp, Kp) == (M, K)
        else jnp.pad(features, ((0, Mp - M), (0, Kp - K)))
    )
    w_p = (
        weight_t
        if (Kp, Np) == (K, N)
        else jnp.pad(weight_t, ((0, Kp - K), (0, Np - N)))
    )
    b_p = bias2d if Np == N else jnp.pad(bias2d, ((0, 0), (0, Np - N)))

    p3_budget = (
        2 * (tm_eff * tk_eff * in_isz + tk_eff * tn_eff * in_isz
             + tn_eff * in_isz + tm_eff * tn_eff * out_isz)
        + tm_eff * tn_eff * 4
    )
    vmem_limit = int(min(max(2 * p3_budget, 16 << 20), 32 << 20))

    out = pl.pallas_call(
        _mlp_tiled_kernel,
        out_shape=jax.ShapeDtypeStruct((Mp, Np), out_dtype),
        grid_spec=pltpu.PrefetchScalarGridSpec(
            num_scalar_prefetch=0,
            grid=(Mp // tm_eff, Np // tn_eff, Kp // tk_eff),
            in_specs=[
                pl.BlockSpec((tm_eff, tk_eff), lambda i, j, k: (i, k)),  # x tile
                pl.BlockSpec((tk_eff, tn_eff), lambda i, j, k: (k, j)),  # w tile
                pl.BlockSpec((1, tn_eff), lambda i, j, k: (0, j)),       # bias tile
            ],
            out_specs=pl.BlockSpec((tm_eff, tn_eff), lambda i, j, k: (i, j)),
            scratch_shapes=[pltpu.VMEM((tm_eff, tn_eff), jnp.float32)],
        ),
        compiler_params=pltpu.CompilerParams(
            dimension_semantics=("parallel", "parallel", "arbitrary"),
            vmem_limit_bytes=vmem_limit,
        ),
    )(x_p, w_p, b_p)
    return out[:M, :N]


# -----------------------------------------------------------------------------
# Demo / correctness checks (small, deterministic)
# -----------------------------------------------------------------------------
if __name__ == "__main__":
    def make_inputs(key, m, in_dim, out_dim):
        k_x, k_w, k_b = jax.random.split(key, 3)
        bound = 1.0 / jnp.sqrt(in_dim)
        x = jax.random.normal(k_x, (m, in_dim), dtype=jnp.float32)
        w = jax.random.uniform(k_w, (out_dim, in_dim), jnp.float32, -bound, bound)
        b = jax.random.uniform(k_b, (out_dim,), jnp.float32, -bound, bound)
        # Pre-transpose the PyTorch-layout weight [out, in] -> [in, out].
        return x, w.T, b

    def reference(x, w_t, b):
        z = jnp.dot(x, w_t, precision=jax.lax.Precision.HIGHEST) + b[None, :]
        return jnp.tanh(z)

    key = jax.random.PRNGKey(0)
    k1, k2, k3 = jax.random.split(key, 3)

    # 1) Small "CLS representation -> projection head" case (single-block path).
    x, w_t, b = make_inputs(k1, 8, 256, 128)
    ref = reference(x, w_t, b)
    out = jax.block_until_ready(mlp_layer(x, w_t, b))
    assert out.shape == (8, 128)
    assert jnp.allclose(out, ref, atol=1e-5, rtol=1e-5), "single-block mismatch"

    # 1b) Same shapes with bf16 operands (f32 accumulate + tanh epilogue).
    out_bf16 = jax.block_until_ready(mlp_layer(x, w_t, b, compute_dtype=jnp.bfloat16))
    assert jnp.allclose(out_bf16, ref, atol=3e-2, rtol=3e-2), "bf16 mismatch"

    # 2) Weight-resident M-tiled path (forced with a small budget); ragged M
    #    exercises the padding path.
    x, w_t, b = make_inputs(k2, 100, 256, 256)
    ref = reference(x, w_t, b)
    out = jax.block_until_ready(
        mlp_layer(x, w_t, b, single_block_max_bytes=0)
    )
    assert out.shape == (100, 256)
    assert jnp.allclose(out, ref, atol=2e-4, rtol=2e-4), "weight-resident mismatch"

    # 3) Fully tiled path (forced); ragged M/N and multiple K steps exercise
    #    the accumulator + bias-init-at-k0 logic.
    x, w_t, b = make_inputs(k3, 100, 384, 200)
    ref = reference(x, w_t, b)
    out = jax.block_until_ready(
        mlp_layer(
            x, w_t, b,
            tk=128,
            single_block_max_bytes=0,
            weight_resident_max_bytes=0,
        )
    )
    assert out.shape == (100, 200)
    assert jnp.allclose(out, ref, atol=2e-4, rtol=2e-4), "tiled mismatch"

    print("KERNEL_OK")
</pallas_src>

<mosaic_0001>
module attributes {stable_mosaic.version = 11 : i64} {
  func.func @_mlp_fused_kernel(%arg0: memref<8x256xf32, #tpu.memory_space<vmem>>, %arg1: memref<256x128xf32, #tpu.memory_space<vmem>>, %arg2: memref<1x128xf32, #tpu.memory_space<vmem>>, %arg3: memref<8x128xf32, #tpu.memory_space<vmem>>) attributes {dimension_semantics = [], scalar_prefetch = 0 : i64, scratch_operands = 0 : i64, tpu.core_type = #tpu.core_type<tc>} {
    %c0 = arith.constant 0 : index
    %c0_0 = arith.constant 0 : index
    %0 = vector.load %arg0[%c0, %c0_0] : memref<8x256xf32, #tpu.memory_space<vmem>>, vector<8x256xf32>
    %c0_1 = arith.constant 0 : index
    %c0_2 = arith.constant 0 : index
    %1 = vector.load %arg1[%c0_1, %c0_2] : memref<256x128xf32, #tpu.memory_space<vmem>>, vector<256x128xf32>
    %cst = arith.constant dense<0.000000e+00> : vector<8x128xf32>
    %2 = tpu.matmul %0, %1, %cst {dimension_numbers = #tpu.dot_dimension_numbers<[1], [0], [0], [1], [0, 0, 1, 1], [], []>} : vector<8x256xf32>, vector<256x128xf32>, vector<8x128xf32> -> vector<8x128xf32>
    %c0_3 = arith.constant 0 : index
    %c0_4 = arith.constant 0 : index
    %3 = vector.load %arg2[%c0_3, %c0_4] : memref<1x128xf32, #tpu.memory_space<vmem>>, vector<1x128xf32>
    %4 = vector.broadcast %3 : vector<1x128xf32> to vector<8x128xf32>
    %5 = arith.addf %2, %4 : vector<8x128xf32>
    %6 = math.tanh %5 : vector<8x128xf32>
    %c0_5 = arith.constant 0 : index
    %c0_6 = arith.constant 0 : index
    %7 = vector.load %arg3[%c0_5, %c0_6] : memref<8x128xf32, #tpu.memory_space<vmem>>, vector<8x128xf32>
    tpu.vector_store %arg3[%c0_5, %c0_6], %6 {strides = array<i32>} : memref<8x128xf32, #tpu.memory_space<vmem>>, vector<8x128xf32>,
    return
  }
}

</mosaic_0001>

<bundles_post_ra>
// kernel: mlp_layer.1
= control target key start
LH: loop header
LB: loop body
LE: loop exit
PB: predicated region body
PF: predicated region fallthrough
CT: control target
= control target key end

     0   :  { %8 = vsyncpa [#allocation3], 0  ;;  %s266_s0 = inlined_call_operand.hbm [shape: f32[8,256], index: 0, kind: input, shape index: {}]   ;;  %s267_s1 = inlined_call_operand.hbm [shape: f32[256,128], index: 1, kind: input, shape index: {}]   ;;  %s268_s2 = inlined_call_operand.vmem [shape: f32[1,128], index: 2, kind: input, shape index: {}]   ;;  %s269_s3 = inlined_call_operand.hbm [shape: f32[8,128], index: 3, kind: output, shape index: {}]  }
   0x1   :  { %9 = vsyncpa [#allocation6], 0 }
   0x2   :  { %10 = vsyncpa [#allocation4], 0  ;;  %s16_s14 = sshll.u32 %s266_s0, 4  ;;  %s229_s15 = smov [#allocation2]   ;;  %s17_s14 = int_to_ptr.hbm [resolvable:$true] %s16_s14 }
   0x3   :  { %s18_s16 = sshll.u32 %s229_s15, 4  ;;  %s26_s19 = sshll.u32 %s267_s1, 4  ;;  %s19_s16 = int_to_ptr.vmem [resolvable:$true] %s18_s16  ;;  %s27_s19 = int_to_ptr.hbm [resolvable:$true] %s26_s19 }
   0x4   :  { %21 = dma.hbm_to_vmem [thread:$0]  %s17_s14, 256, %s19_s16, [#allocation3]  }
   0x5   :  { %s230_s20 = smov [#allocation5]   ;;  %s231_s22 = smov 128  }
   0x6   :  { %s28_s21 = sshll.u32 %s230_s20, 4  ;;  %s232_s23 = smov 8   ;;  %s29_s21 = int_to_ptr.vmem [resolvable:$true] %s28_s21 }
   0x7   :  { %34 = dma.hbm_to_vmem [thread:$0]  %s27_s19, 4096, %s29_s21, [#allocation6], %s231_s22, %s231_s22, %s232_s23  }
   0x8   :  { %223 = dma.done.wait [#allocation3], 256  }
   0x9   :  { %224 = vsyncadd [#allocation3], 4294967040 }
   0xa   :  { %225 = dma.done.wait [#allocation6], 4096  }
   0xb   :  { %226 = vsyncadd [#allocation6], 4294963200  ;;  %v62_v0 = vld [vmem:[#allocation5 + $0x78] sm:$0xff]  ;;  %v61_v1 = vld [vmem:[#allocation5 + $0x70] sm:$0xff]  ;;  %s233_s24 = smov [#allocation7]   ;;  %s132_s28 = sshll.u32 %s269_s3, 4  ;;  %s133_s28 = int_to_ptr.hbm [resolvable:$true] %s132_s28 }
   0xc   :  { %v78_v2 = vld [vmem:[#allocation5 + $0xf8] sm:$0xff]  ;;  %83 = vmatpush.msra.mxu0 %v62_v0  ;;  %v77_v3 = vld [vmem:[#allocation5 + $0xf0] sm:$0xff]  ;;  %v60_v4 = vld [vmem:[#allocation5 + $0x68] sm:$0xff]  ;;  %s130_s25 = sshll.u32 %s233_s24, 4  ;;  %s131_s25 = int_to_ptr.vmem [resolvable:$true] %s130_s25 }
   0xd   :  { %103 = vmatpush.msra.mxu1 %v78_v2  ;;  %v76_v5 = vld [vmem:[#allocation5 + $0xe8] sm:$0xff]  ;;  %v59_v6 = vld [vmem:[#allocation5 + $0x60] sm:$0xff]  ;;  %v58_v8 = vld [vmem:[#allocation5 + $0x58] sm:$0xff] }
   0xe   :  { %84 = vmatpush.msra.mxu0 %v61_v1  ;;  %v75_v7 = vld [vmem:[#allocation5 + $0xe0] sm:$0xff]  ;;  %v74_v9 = vld [vmem:[#allocation5 + $0xd8] sm:$0xff]  ;;  %v57_v10 = vld [vmem:[#allocation5 + $0x50] sm:$0xff] }
   0xf   :  { %104 = vmatpush.msra.mxu1 %v77_v3  ;;  %v73_v11 = vld [vmem:[#allocation5 + $0xd0] sm:$0xff]  ;;  %v56_v12 = vld [vmem:[#allocation5 + $0x48] sm:$0xff]  ;;  %v55_v14 = vld [vmem:[#allocation5 + $0x40] sm:$0xff] }
  0x10   :  { %85 = vmatpush.msra.mxu0 %v60_v4  ;;  %v72_v13 = vld [vmem:[#allocation5 + $0xc8] sm:$0xff]  ;;  %v71_v15 = vld [vmem:[#allocation5 + $0xc0] sm:$0xff]  ;;  %v54_v16 = vld [vmem:[#allocation5 + $0x38] sm:$0xff] }
  0x11   :  { %105 = vmatpush.msra.mxu1 %v76_v5  ;;  %v70_v17 = vld [vmem:[#allocation5 + $0xb8] sm:$0xff]  ;;  %v53_v18 = vld [vmem:[#allocation5 + $0x30] sm:$0xff]  ;;  %v52_v20 = vld [vmem:[#allocation5 + $0x28] sm:$0xff] }
  0x12   :  { %86 = vmatpush.msra.mxu0 %v59_v6  ;;  %v69_v19 = vld [vmem:[#allocation5 + $0xb0] sm:$0xff]  ;;  %v68_v21 = vld [vmem:[#allocation5 + $0xa8] sm:$0xff]  ;;  %v51_v22 = vld [vmem:[#allocation5 + $0x20] sm:$0xff] }
  0x13   :  { %106 = vmatpush.msra.mxu1 %v75_v7  ;;  %v67_v23 = vld [vmem:[#allocation5 + $0xa0] sm:$0xff]  ;;  %v50_v24 = vld [vmem:[#allocation5 + $0x18] sm:$0xff]  ;;  %v49_v26 = vld [vmem:[#allocation5 + $0x10] sm:$0xff] }
  0x14   :  { %87 = vmatpush.msra.mxu0 %v58_v8  ;;  %v66_v25 = vld [vmem:[#allocation5 + $0x98] sm:$0xff]  ;;  %v65_v27 = vld [vmem:[#allocation5 + $0x90] sm:$0xff]  ;;  %v48_v28 = vld [vmem:[#allocation5 + $0x8] sm:$0xff] }
  0x15   :  { %107 = vmatpush.msra.mxu1 %v74_v9  ;;  %v64_v29 = vld [vmem:[#allocation5 + $0x88] sm:$0xff]  ;;  %v47_v30 = vld [vmem:[#allocation5] sm:$0xff]  ;;  %v45_v32 = vld [vmem:[#allocation2] sm:$0xff] }
  0x16   :  { %88 = vmatpush.msra.mxu0 %v57_v10  ;;  %v63_v31 = vld [vmem:[#allocation5 + $0x80] sm:$0xff]  ;;  %v46_v33 = vld [vmem:[#allocation2 + $0x8] sm:$0xff]  ;;  %v148_v34 = vld [vmem:[%s268_s2] ss:$0 sm:$0xff] }
  0x17   :  { %108 = vmatpush.msra.mxu1 %v73_v11 }
  0x18   :  { %89 = vmatpush.msra.mxu0 %v56_v12 }
  0x19   :  { %109 = vmatpush.msra.mxu1 %v72_v13 }
  0x1a   :  { %90 = vmatpush.msra.mxu0 %v55_v14 }
  0x1b   :  { %110 = vmatpush.msra.mxu1 %v71_v15 }
  0x1c   :  { %91 = vmatpush.msra.mxu0 %v54_v16 }
  0x1d   :  { %111 = vmatpush.msra.mxu1 %v70_v17 }
  0x1e   :  { %92 = vmatpush.msra.mxu0 %v53_v18 }
  0x1f   :  { %112 = vmatpush.msra.mxu1 %v69_v19 }
  0x20   :  { %93 = vmatpush.msra.mxu0 %v52_v20 }
  0x21   :  { %113 = vmatpush.msra.mxu1 %v68_v21 }
  0x22   :  { %94 = vmatpush.msra.mxu0 %v51_v22 }
  0x23   :  { %114 = vmatpush.msra.mxu1 %v67_v23 }
  0x24   :  { %95 = vmatpush.msra.mxu0 %v50_v24 }
  0x25   :  { %115 = vmatpush.msra.mxu1 %v66_v25 }
  0x26   :  { %96 = vmatpush.msra.mxu0 %v49_v26 }
  0x27   :  { %116 = vmatpush.msra.mxu1 %v65_v27 }
  0x28   :  { %97 = vmatpush.msra.mxu0 %v48_v28 }
  0x29   :  { %117 = vmatpush.msra.mxu1 %v64_v29 }
  0x2a   :  { %98 = vmatpush.msra.mxu0 %v47_v30 }
  0x2b   :  { %118 = vmatpush.msra.mxu1 %v63_v31  ;;  %99 = vmatmul.f32.vlgmr.msra.gmra.mxu0 %v45_v32 }
  0x2c   :  { %119 = vmatmul.f32.vlgmr.msra.gmra.mxu1 %v46_v33 }
  0xa8   :  { %v100_v35 = vpop.f32.mrf.mxu0 }
  0xa9   :  { %v120_v36 = vpop.f32.mrf.mxu1  ;;  %v101_v37 = vadd.f32 %v148_v34, %v100_v35 }
  0xab   :  { %v121_v38 = vadd.f32 %v120_v36, %v101_v37 }
  0xad   :  { %149 = vtanh.f32 %v121_v38 }
  0xb3   :  { %v150_v39 = vpop.eup %149 }
  0xb4   :  { %124 = vst [vmem:[#allocation7] sm:$0xff] %v150_v39 }
  0xb5   :  { %135 = dma.vmem_to_hbm [thread:$0]  %s131_s25, 128, %s133_s28, [#allocation4]  }
  0xb6   :  { %227 = dma.done.wait [#allocation4], 128  }
  0xb7   :  { %228 = vsyncadd [#allocation4], 4294967168 }
  0xb8   :  { %140 = vsyncpa [#allocation3], 1 }
  0xb9   :  { %141 = vsyncpa [#allocation6], 1 }
  0xba   :  { %142 = vsyncpa [#allocation4], 1 }

</bundles_post_ra>
